<compile_context>
chip_gen: v7x
topology: tpu7x:2x2x1
jax: 0.10.0
libtpu: 0.0.40
codegen_flags: <defaults>
</compile_context>

<pallas_src>
import functools

import jax
import jax.numpy as jnp
from jax.experimental import pallas as pl
from jax.experimental.pallas import tpu as pltpu


def _double_conv_kernel(x_hbm, w1b_ref, b1_ref, w2b_ref, b2_ref, out_ref,
                        xbuf, dma_sem, *, TH, H, HP, LIN, LOUT):
    """One (batch, row-tile) step of the fused DoubleConv.

    x_hbm  : HBM ref, (N*(H+4), W*C_in)   zero-row-padded, lane-dense input
    w1b_ref: (3, W*C_in,  W*C_out)        banded conv1 weights (BN folded), per dy
    b1_ref : (1, W*C_out)                 folded BN shift, tiled across W
    w2b_ref: (3, W*C_out, W*C_out)        banded conv2 weights (BN folded)
    b2_ref : (1, W*C_out)
    out_ref: (TH, W*C_out)                lane-dense output rows for this tile
    xbuf   : VMEM (TH+4, W*C_in)          manually DMA'd rows (+2 halo each side)
    dma_sem: DMA semaphore
    """
    n = pl.program_id(0)
    t = pl.program_id(1)
    row0 = t * TH                    # first output row of this tile
    R1 = TH + 2                      # conv1 rows needed by conv2 (+-1 halo)

    # ---- manual halo DMA: padded rows [row0, row0 + TH + 4) of batch n ------
    # TODO(synk): single-buffered (start+wait); double-buffer across grid steps
    #             if the per-step input DMA ever shows up as exposed latency.
    base = n * HP + row0
    cp = pltpu.make_async_copy(x_hbm.at[pl.ds(base, TH + 4), :], xbuf, dma_sem)
    cp.start()
    cp.wait()

    # ---- conv1 + folded BN + ReLU over TH+2 rows ----------------------------
    # Banded matmul: the dx shifts and the zero column padding live inside
    # w1b_ref, so only 3 dy sublane-shifted row slabs are read.
    # MXU shape per push: (R1, W*C_in) x (W*C_in, W*C_out).
    y1 = jnp.dot(xbuf[0:R1, :], w1b_ref[0], preferred_element_type=jnp.float32)
    for dy in (1, 2):
        y1 += jnp.dot(xbuf[dy:dy + R1, :], w1b_ref[dy],
                      preferred_element_type=jnp.float32)
    y1 = jnp.maximum(y1 + b1_ref[...], 0.0)

    # conv2's spatial zero padding applies to conv1's *output*: halo rows that
    # fall outside the image must be exactly zero.  (R1, 1) mask, lane-broadcast.
    r_img = row0 - 1 + jax.lax.broadcasted_iota(jnp.int32, (R1, 1), 0)
    y1 = jnp.where((r_img >= 0) & (r_img < H), y1, 0.0)
    y1 = y1.astype(w2b_ref.dtype)

    # ---- conv2 + folded BN + ReLU -------------------------------------------
    # MXU shape per push: (TH, W*C_out) x (W*C_out, W*C_out).
    y2 = jnp.dot(y1[0:TH, :], w2b_ref[0], preferred_element_type=jnp.float32)
    for dy in (1, 2):
        y2 += jnp.dot(y1[dy:dy + TH, :], w2b_ref[dy],
                      preferred_element_type=jnp.float32)
    y2 = jnp.maximum(y2 + b2_ref[...], 0.0)

    out_ref[...] = y2.astype(out_ref.dtype)   # dense (TH, W*C_out) store


def _fold_bn_into_conv(w, gamma, beta, mean, var, eps):
    scale = gamma / jnp.sqrt(var + eps)                 # (C_out,)
    w_eff = w * scale[:, None, None, None]              # scale per out-channel
    bias = beta - mean * scale
    return w_eff, bias


def _banded_conv_weights(w_eff, W):
    """(C_out, C_in, 3, 3) -> (3, W*C_in, W*C_out) banded matrices, one per dy.

    band[dy, wi*C_in + ci, wo*C_out + co] = w_eff[co, ci, dy, wi - wo + 1]
    for wi in {wo-1, wo, wo+1} ∩ [0, W); zero elsewhere.  Dropping the
    out-of-range wi rows implements the conv's zero *column* padding for free.
    """
    C_in = w_eff.shape[1]
    C_out = w_eff.shape[0]
    w_k = jnp.transpose(w_eff, (2, 3, 1, 0))                  # (dy, dx, ci, co)
    wi = jnp.arange(W)[:, None]
    wo = jnp.arange(W)[None, :]
    sel = jnp.stack([(wi == wo + dx - 1) for dx in range(3)],
                    axis=0).astype(w_eff.dtype)               # (dx, wi, wo)
    band = jnp.einsum("xab,dxio->daibo", sel, w_k)            # (dy, wi, ci, wo, co)
    return band.reshape(3, W * C_in, W * C_out)


def _pick_row_tile(H, row_tile):
    # Largest divisor of H that is a multiple of 8 (sublane-aligned output
    # block) and <= row_tile; otherwise fall back to the full height.
    # TODO(synk): ragged/odd H falls back to TH = H (large VMEM for huge odd H);
    #             a masked last tile would remove that fallback.
    cands = [d for d in range(8, min(row_tile, H) + 1, 8) if H % d == 0]
    return max(cands) if cands else H


def double_conv(x_nchw, params, *, eps=1e-5, compute_dtype=jnp.float32,
                row_tile=16):
    """x_nchw: (N, C_in, H, W) float32; params: conv/BN parameters (PyTorch layout)."""
    N, C_in, H, W = x_nchw.shape
    C_out = params["w1"].shape[0]
    LIN, LOUT = W * C_in, W * C_out
    TH = _pick_row_tile(H, row_tile)
    nT = H // TH
    HP = H + 4

    # NOTE: keep LOUT (= W*C_out, 128 for the test shape) a multiple of 128 for
    # dense output stores; other shapes fall back to masked vst.msk stores.

    # Fold eval-mode BN into the conv weights; build banded (Toeplitz) matrices.
    w1_eff, bias1 = _fold_bn_into_conv(params["w1"], params["g1"], params["b1"],
                                       params["m1"], params["v1"], eps)
    w2_eff, bias2 = _fold_bn_into_conv(params["w2"], params["g2"], params["b2"],
                                       params["m2"], params["v2"], eps)
    w1_band = _banded_conv_weights(w1_eff, W).astype(compute_dtype)   # (3, LIN, LOUT)
    w2_band = _banded_conv_weights(w2_eff, W).astype(compute_dtype)   # (3, LOUT, LOUT)
    b1_row = jnp.tile(bias1, W).reshape(1, LOUT).astype(jnp.float32)
    b2_row = jnp.tile(bias2, W).reshape(1, LOUT).astype(jnp.float32)

    # NCHW -> lane-dense rows (N, H, W*C_in); pad 2 zero rows each side (fused
    # 3x3+3x3 receptive field); flatten batch into the row axis so the kernel's
    # halo DMA is a single dynamic row slice.  No per-tile duplication in HBM.
    x_rows = jnp.transpose(x_nchw, (0, 2, 3, 1)).reshape(N, H, LIN)
    x_rows = jnp.pad(x_rows, ((0, 0), (2, 2), (0, 0))).astype(compute_dtype)
    x_rows = x_rows.reshape(N * HP, LIN)

    kernel = functools.partial(_double_conv_kernel,
                               TH=TH, H=H, HP=HP, LIN=LIN, LOUT=LOUT)

    # VMEM budget (cap below v7x's 64 MiB physical per-TC VMEM).
    itemsize = jnp.dtype(compute_dtype).itemsize
    tile_bytes = ((TH + 4) * LIN * itemsize                    # xbuf scratch
                  + 2 * TH * LOUT * 4                          # output (2x buffered)
                  + 3 * (LIN + LOUT) * LOUT * itemsize         # banded weights
                  + 2 * LOUT * 4)                              # bias rows
    vmem_limit = int(min(max(4 * tile_bytes, 16 << 20), 48 << 20))

    out = pl.pallas_call(
        kernel,
        out_shape=jax.ShapeDtypeStruct((N, H, LOUT), jnp.float32),
        grid=(N, nT),
        in_specs=[
            pl.BlockSpec(memory_space=pl.ANY),                       # raw HBM, manual DMA
            pl.BlockSpec((3, LIN, LOUT), lambda n, t: (0, 0, 0)),    # w1_band (resident)
            pl.BlockSpec((1, LOUT), lambda n, t: (0, 0)),            # b1_row
            pl.BlockSpec((3, LOUT, LOUT), lambda n, t: (0, 0, 0)),   # w2_band
            pl.BlockSpec((1, LOUT), lambda n, t: (0, 0)),            # b2_row
        ],
        out_specs=pl.BlockSpec((None, TH, LOUT), lambda n, t: (n, t, 0)),
        scratch_shapes=[pltpu.VMEM((TH + 4, LIN), compute_dtype),
                        pltpu.SemaphoreType.DMA(())],
        compiler_params=pltpu.CompilerParams(
            dimension_semantics=("parallel", "parallel"),
            vmem_limit_bytes=vmem_limit),
    )(x_rows, w1_band, b1_row, w2_band, b2_row)

    # (N, H, W*C_out) -> (N, H, W, C_out) -> NCHW
    return jnp.transpose(out.reshape(N, H, W, C_out), (0, 3, 1, 2))


def _reference_double_conv(x_nchw, params, eps=1e-5):
    """Plain-JAX reference (lax conv, NCHW) mirroring the PyTorch module in eval mode."""
    def conv(x, w):
        return jax.lax.conv_general_dilated(
            x, w, window_strides=(1, 1), padding=((1, 1), (1, 1)),
            dimension_numbers=("NCHW", "OIHW", "NCHW"))

    def bn_relu(x, g, b, m, v):
        scale = (g / jnp.sqrt(v + eps)).reshape(1, -1, 1, 1)
        shift = (b - m * g / jnp.sqrt(v + eps)).reshape(1, -1, 1, 1)
        return jnp.maximum(x * scale + shift, 0.0)

    y = bn_relu(conv(x_nchw, params["w1"]),
                params["g1"], params["b1"], params["m1"], params["v1"])
    y = bn_relu(conv(y, params["w2"]),
                params["g2"], params["b2"], params["m2"], params["v2"])
    return y


if __name__ == "__main__":
    N, C_in, C_out, H, W = 2, 4, 8, 16, 16

    key = jax.random.PRNGKey(0)
    k1, k2, kx = jax.random.split(key, 3)

    params = {
        "w1": jax.random.normal(k1, (C_out, C_in, 3, 3), jnp.float32) * 0.1,
        "w2": jax.random.normal(k2, (C_out, C_out, 3, 3), jnp.float32) * 0.1,
        "g1": jnp.linspace(0.5, 1.5, C_out, dtype=jnp.float32),
        "b1": jnp.linspace(-0.2, 0.2, C_out, dtype=jnp.float32),
        "m1": 0.01 * jnp.arange(C_out, dtype=jnp.float32),
        "v1": jnp.linspace(0.5, 2.0, C_out, dtype=jnp.float32),
        "g2": jnp.linspace(1.2, 0.8, C_out, dtype=jnp.float32),
        "b2": jnp.linspace(0.1, -0.1, C_out, dtype=jnp.float32),
        "m2": -0.02 * jnp.arange(C_out, dtype=jnp.float32),
        "v2": jnp.linspace(0.8, 1.6, C_out, dtype=jnp.float32),
    }

    x = jax.random.normal(kx, (N, C_in, H, W), jnp.float32)

    ref = jax.block_until_ready(_reference_double_conv(x, params))

    # f32 MXU path, full-height row tile -> grid (N, 1).
    out_f32 = jax.block_until_ready(double_conv(x, params))
    assert out_f32.shape == (N, C_out, H, W)
    assert jnp.allclose(out_f32, ref, atol=2e-4, rtol=2e-4), \
        f"f32 max abs err = {jnp.max(jnp.abs(out_f32 - ref))}"

    # Tiled path (TH=8, grid (N, 2)) exercises the overlapping-halo manual DMA.
    out_tiled = jax.block_until_ready(double_conv(x, params, row_tile=8))
    assert jnp.allclose(out_tiled, ref, atol=2e-4, rtol=2e-4), \
        f"tiled max abs err = {jnp.max(jnp.abs(out_tiled - ref))}"

    # bf16 MXU path (v6e/v7x; optional on v5e): matmul inputs bf16, accum f32.
    out_bf16 = jax.block_until_ready(
        double_conv(x, params, compute_dtype=jnp.bfloat16))
    assert jnp.allclose(out_bf16, ref, atol=5e-2, rtol=5e-2), \
        f"bf16 max abs err = {jnp.max(jnp.abs(out_bf16 - ref))}"

    print("KERNEL_OK")
</pallas_src>

<mosaic_0001>
module attributes {stable_mosaic.version = 11 : i64} {
  func.func @_double_conv_kernel(%arg0: i32, %arg1: i32, %arg2: memref<40x64xf32, #tpu.memory_space<any>>, %arg3: memref<3x64x128xf32, #tpu.memory_space<vmem>>, %arg4: memref<1x128xf32, #tpu.memory_space<vmem>>, %arg5: memref<3x128x128xf32, #tpu.memory_space<vmem>>, %arg6: memref<1x128xf32, #tpu.memory_space<vmem>>, %arg7: memref<1x16x128xf32, #tpu.memory_space<vmem>>, %arg8: memref<20x64xf32, #tpu.memory_space<vmem>>, %arg9: memref<!tpu.dma_semaphore, #tpu.memory_space<semaphore_mem>>) attributes {dimension_semantics = [#tpu.dimension_semantics<parallel>, #tpu.dimension_semantics<parallel>], iteration_bounds = array<i64: 2, 1>, scalar_prefetch = 0 : i64, scratch_operands = 2 : i64, tpu.core_type = #tpu.core_type<tc>, window_params = [{}, {pipeline_mode = #tpu.pipeline_mode<synchronous>, transform_indices = @transform_1, window_bounds = array<i64: 3, 64, 128>}, {pipeline_mode = #tpu.pipeline_mode<synchronous>, transform_indices = @transform_2, window_bounds = array<i64: 1, 128>}, {pipeline_mode = #tpu.pipeline_mode<synchronous>, transform_indices = @transform_3, window_bounds = array<i64: 3, 128, 128>}, {pipeline_mode = #tpu.pipeline_mode<synchronous>, transform_indices = @transform_4, window_bounds = array<i64: 1, 128>}, {transform_indices = @transform_5, window_bounds = array<i64: 1, 16, 128>}]} {
    %c16_i32 = arith.constant 16 : i32
    %0 = arith.muli %arg1, %c16_i32 : i32
    %c20_i32 = arith.constant 20 : i32
    %1 = arith.muli %arg0, %c20_i32 : i32
    %2 = arith.addi %1, %0 : i32
    %c0_i32 = arith.constant 0 : i32
    %3 = tpu.memref_slice %arg2[%2, %c0_i32] : memref<40x64xf32, #tpu.memory_space<any>> -> memref<20x64xf32, #tpu.memory_space<any>>
    tpu.enqueue_dma source(%3 : memref<20x64xf32, #tpu.memory_space<any>>) target(%arg8 : memref<20x64xf32, #tpu.memory_space<vmem>>) target_semaphore(%arg9 : memref<!tpu.dma_semaphore, #tpu.memory_space<semaphore_mem>>)
    %c0_i32_0 = arith.constant 0 : i32
    %4 = tpu.memref_slice %arg2[%2, %c0_i32_0] : memref<40x64xf32, #tpu.memory_space<any>> -> memref<20x64xf32, #tpu.memory_space<any>>
    tpu.wait_dma2 semaphore(%arg9 : memref<!tpu.dma_semaphore, #tpu.memory_space<semaphore_mem>>) src(%4 : memref<20x64xf32, #tpu.memory_space<any>>) dst(%arg8 : memref<20x64xf32, #tpu.memory_space<vmem>>)
    %c0 = arith.constant 0 : index
    %c0_1 = arith.constant 0 : index
    %5 = vector.load %arg8[%c0, %c0_1] : memref<20x64xf32, #tpu.memory_space<vmem>>, vector<18x64xf32>
    %c0_2 = arith.constant 0 : index
    %c0_3 = arith.constant 0 : index
    %c0_4 = arith.constant 0 : index
    %6 = vector.load %arg3[%c0_2, %c0_3, %c0_4] : memref<3x64x128xf32, #tpu.memory_space<vmem>>, vector<1x64x128xf32>
    %7 = vector.shape_cast %6 : vector<1x64x128xf32> to vector<64x128xf32>
    %cst = arith.constant dense<0.000000e+00> : vector<18x128xf32>
    %8 = tpu.matmul %5, %7, %cst {dimension_numbers = #tpu.dot_dimension_numbers<[1], [0], [0], [1], [0, 0, 1, 1], [], []>} : vector<18x64xf32>, vector<64x128xf32>, vector<18x128xf32> -> vector<18x128xf32>
    %c1 = arith.constant 1 : index
    %c0_5 = arith.constant 0 : index
    %9 = vector.load %arg8[%c1, %c0_5] : memref<20x64xf32, #tpu.memory_space<vmem>>, vector<18x64xf32>
    %c1_6 = arith.constant 1 : index
    %c0_7 = arith.constant 0 : index
    %c0_8 = arith.constant 0 : index
    %10 = vector.load %arg3[%c1_6, %c0_7, %c0_8] : memref<3x64x128xf32, #tpu.memory_space<vmem>>, vector<1x64x128xf32>
    %11 = vector.shape_cast %10 : vector<1x64x128xf32> to vector<64x128xf32>
    %cst_9 = arith.constant dense<0.000000e+00> : vector<18x128xf32>
    %12 = tpu.matmul %9, %11, %cst_9 {dimension_numbers = #tpu.dot_dimension_numbers<[1], [0], [0], [1], [0, 0, 1, 1], [], []>} : vector<18x64xf32>, vector<64x128xf32>, vector<18x128xf32> -> vector<18x128xf32>
    %13 = arith.addf %8, %12 : vector<18x128xf32>
    %c2 = arith.constant 2 : index
    %c0_10 = arith.constant 0 : index
    %14 = vector.load %arg8[%c2, %c0_10] : memref<20x64xf32, #tpu.memory_space<vmem>>, vector<18x64xf32>
    %c2_11 = arith.constant 2 : index
    %c0_12 = arith.constant 0 : index
    %c0_13 = arith.constant 0 : index
    %15 = vector.load %arg3[%c2_11, %c0_12, %c0_13] : memref<3x64x128xf32, #tpu.memory_space<vmem>>, vector<1x64x128xf32>
    %16 = vector.shape_cast %15 : vector<1x64x128xf32> to vector<64x128xf32>
    %cst_14 = arith.constant dense<0.000000e+00> : vector<18x128xf32>
    %17 = tpu.matmul %14, %16, %cst_14 {dimension_numbers = #tpu.dot_dimension_numbers<[1], [0], [0], [1], [0, 0, 1, 1], [], []>} : vector<18x64xf32>, vector<64x128xf32>, vector<18x128xf32> -> vector<18x128xf32>
    %18 = arith.addf %13, %17 : vector<18x128xf32>
    %c0_15 = arith.constant 0 : index
    %c0_16 = arith.constant 0 : index
    %19 = vector.load %arg4[%c0_15, %c0_16] : memref<1x128xf32, #tpu.memory_space<vmem>>, vector<1x128xf32>
    %20 = vector.broadcast %19 : vector<1x128xf32> to vector<18x128xf32>
    %21 = arith.addf %18, %20 : vector<18x128xf32>
    %cst_17 = arith.constant 0.000000e+00 : f32
    %22 = vector.broadcast %cst_17 : f32 to vector<18x128xf32>
    %23 = arith.maximumf %21, %22 : vector<18x128xf32>
    %c1_i32 = arith.constant 1 : i32
    %24 = arith.subi %0, %c1_i32 : i32
    %25 = tpu.iota {dimensions = array<i32: 0>} : vector<18x1xi32>
    %26 = vector.broadcast %24 : i32 to vector<18x1xi32>
    %27 = arith.addi %26, %25 : vector<18x1xi32>
    %c0_i32_18 = arith.constant 0 : i32
    %28 = vector.broadcast %c0_i32_18 : i32 to vector<18x1xi32>
    %29 = arith.cmpi sge, %27, %28 : vector<18x1xi32>
    %c16_i32_19 = arith.constant 16 : i32
    %30 = vector.broadcast %c16_i32_19 : i32 to vector<18x1xi32>
    %31 = arith.cmpi slt, %27, %30 : vector<18x1xi32>
    %32 = arith.andi %29, %31 : vector<18x1xi1>
    %cst_20 = arith.constant 0.000000e+00 : f32
    %33 = vector.shape_cast %32 : vector<18x1xi1> to vector<18x1xi1>
    %34 = vector.broadcast %33 : vector<18x1xi1> to vector<18x128xi1>
    %35 = vector.broadcast %cst_20 : f32 to vector<18x128xf32>
    %36 = arith.select %34, %23, %35 : vector<18x128xi1>, vector<18x128xf32>
    %37 = vector.extract_strided_slice %36 {offsets = [0, 0], sizes = [16, 128], strides = [1, 1]} : vector<18x128xf32> to vector<16x128xf32>
    %c0_21 = arith.constant 0 : index
    %c0_22 = arith.constant 0 : index
    %c0_23 = arith.constant 0 : index
    %38 = vector.load %arg5[%c0_21, %c0_22, %c0_23] : memref<3x128x128xf32, #tpu.memory_space<vmem>>, vector<1x128x128xf32>
    %39 = vector.shape_cast %38 : vector<1x128x128xf32> to vector<128x128xf32>
    %cst_24 = arith.constant dense<0.000000e+00> : vector<16x128xf32>
    %40 = tpu.matmul %37, %39, %cst_24 {dimension_numbers = #tpu.dot_dimension_numbers<[1], [0], [0], [1], [0, 0, 1, 1], [], []>} : vector<16x128xf32>, vector<128x128xf32>, vector<16x128xf32> -> vector<16x128xf32>
    %41 = vector.extract_strided_slice %36 {offsets = [1, 0], sizes = [16, 128], strides = [1, 1]} : vector<18x128xf32> to vector<16x128xf32>
    %c1_25 = arith.constant 1 : index
    %c0_26 = arith.constant 0 : index
    %c0_27 = arith.constant 0 : index
    %42 = vector.load %arg5[%c1_25, %c0_26, %c0_27] : memref<3x128x128xf32, #tpu.memory_space<vmem>>, vector<1x128x128xf32>
    %43 = vector.shape_cast %42 : vector<1x128x128xf32> to vector<128x128xf32>
    %cst_28 = arith.constant dense<0.000000e+00> : vector<16x128xf32>
    %44 = tpu.matmul %41, %43, %cst_28 {dimension_numbers = #tpu.dot_dimension_numbers<[1], [0], [0], [1], [0, 0, 1, 1], [], []>} : vector<16x128xf32>, vector<128x128xf32>, vector<16x128xf32> -> vector<16x128xf32>
    %45 = arith.addf %40, %44 : vector<16x128xf32>
    %46 = vector.extract_strided_slice %36 {offsets = [2, 0], sizes = [16, 128], strides = [1, 1]} : vector<18x128xf32> to vector<16x128xf32>
    %c2_29 = arith.constant 2 : index
    %c0_30 = arith.constant 0 : index
    %c0_31 = arith.constant 0 : index
    %47 = vector.load %arg5[%c2_29, %c0_30, %c0_31] : memref<3x128x128xf32, #tpu.memory_space<vmem>>, vector<1x128x128xf32>
    %48 = vector.shape_cast %47 : vector<1x128x128xf32> to vector<128x128xf32>
    %cst_32 = arith.constant dense<0.000000e+00> : vector<16x128xf32>
    %49 = tpu.matmul %46, %48, %cst_32 {dimension_numbers = #tpu.dot_dimension_numbers<[1], [0], [0], [1], [0, 0, 1, 1], [], []>} : vector<16x128xf32>, vector<128x128xf32>, vector<16x128xf32> -> vector<16x128xf32>
    %50 = arith.addf %45, %49 : vector<16x128xf32>
    %c0_33 = arith.constant 0 : index
    %c0_34 = arith.constant 0 : index
    %51 = vector.load %arg6[%c0_33, %c0_34] : memref<1x128xf32, #tpu.memory_space<vmem>>, vector<1x128xf32>
    %52 = vector.broadcast %51 : vector<1x128xf32> to vector<16x128xf32>
    %53 = arith.addf %50, %52 : vector<16x128xf32>
    %cst_35 = arith.constant 0.000000e+00 : f32
    %54 = vector.broadcast %cst_35 : f32 to vector<16x128xf32>
    %55 = arith.maximumf %53, %54 : vector<16x128xf32>
    %c0_36 = arith.constant 0 : index
    %c0_37 = arith.constant 0 : index
    %c0_38 = arith.constant 0 : index
    %56 = vector.load %arg7[%c0_36, %c0_37, %c0_38] : memref<1x16x128xf32, #tpu.memory_space<vmem>>, vector<1x16x128xf32>
    %57 = vector.shape_cast %56 : vector<1x16x128xf32> to vector<16x128xf32>
    %58 = vector.shape_cast %55 : vector<16x128xf32> to vector<1x16x128xf32>
    tpu.vector_store %arg7[%c0_36, %c0_37, %c0_38], %58 {strides = array<i32>} : memref<1x16x128xf32, #tpu.memory_space<vmem>>, vector<1x16x128xf32>,
    return
  }
  func.func @transform_1(%arg0: i32, %arg1: i32) -> (i32, i32, i32) {
    %c0_i32 = arith.constant 0 : i32
    %c0_i32_0 = arith.constant 0 : i32
    %c0_i32_1 = arith.constant 0 : i32
    %c0_i32_2 = arith.constant 0 : i32
    return %c0_i32, %c0_i32_0, %c0_i32_1 : i32, i32, i32
  }
  func.func @transform_2(%arg0: i32, %arg1: i32) -> (i32, i32) {
    %c0_i32 = arith.constant 0 : i32
    %c0_i32_0 = arith.constant 0 : i32
    %c0_i32_1 = arith.constant 0 : i32
    return %c0_i32, %c0_i32_0 : i32, i32
  }
  func.func @transform_3(%arg0: i32, %arg1: i32) -> (i32, i32, i32) {
    %c0_i32 = arith.constant 0 : i32
    %c0_i32_0 = arith.constant 0 : i32
    %c0_i32_1 = arith.constant 0 : i32
    %c0_i32_2 = arith.constant 0 : i32
    return %c0_i32, %c0_i32_0, %c0_i32_1 : i32, i32, i32
  }
  func.func @transform_4(%arg0: i32, %arg1: i32) -> (i32, i32) {
    %c0_i32 = arith.constant 0 : i32
    %c0_i32_0 = arith.constant 0 : i32
    %c0_i32_1 = arith.constant 0 : i32
    return %c0_i32, %c0_i32_0 : i32, i32
  }
  func.func @transform_5(%arg0: i32, %arg1: i32) -> (i32, i32, i32) {
    %c0_i32 = arith.constant 0 : i32
    %c0_i32_0 = arith.constant 0 : i32
    return %arg0, %arg1, %c0_i32 : i32, i32, i32
  }
}

</mosaic_0001>

<bundles_post_ra>
// kernel: tpu_custom_call.1
= control target key start
LH: loop header
LB: loop body
LE: loop exit
PB: predicated region body
PF: predicated region fallthrough
CT: control target
= control target key end

     0   :  { %10 = vsyncpa [#allocation5], 0  ;;  %s1987_s0 = inlined_call_operand.hbm [shape: f32[40,64], index: 0, kind: input, shape index: {}]   ;;  %s1988_s1 = inlined_call_operand.hbm [shape: f32[3,64,128], index: 1, kind: input, shape index: {}]   ;;  %s1989_s2 = inlined_call_operand.vmem [shape: f32[1,128], index: 2, kind: input, shape index: {}]   ;;  %s1990_s3 = inlined_call_operand.hbm [shape: f32[3,128,128], index: 3, kind: input, shape index: {}]   ;;  %s1991_s4 = inlined_call_operand.vmem [shape: f32[1,128], index: 4, kind: input, shape index: {}]   ;;  %s1992_s5 = inlined_call_operand.hbm [shape: f32[2,16,128], index: 5, kind: output, shape index: {}]  }
   0x1   :  { %11 = vsyncpa [#allocation8], 0 }
   0x2   :  { %12 = vsyncpa [#allocation6], 0 }
   0x3   :  { %14 = vsyncpa [#allocation6 + $0x1], 0  ;;  %s1734_s18 = smov 0   ;;  %s1736_s19 = smov 0  }
   0x4   :  { %s1738_s20 = smov 0   ;;  %s1740_s21 = smov 0  }
   0x5   :  { %s1742_s22 = smov 0   ;;  %s1744_s23 = smov 0  }
   0x6 LB: > { %s1006_s24 = sadd.s32 4294967295, %s1691_s23   ;;  %s1007_s25 = sadd.s32 4294967294, %s1691_s23   ;;  %s1691_s23 = sphi %s1744_s23, %s20_s23   ;;  %s1687_s22 = sphi %s1742_s22, %s2013_s22   ;;  %s1683_s21 = sphi %s1740_s21, %s2012_s21   ;;  %s1679_s20 = sphi %s1738_s20, %s2011_s20   ;;  %s1675_s19 = sphi %s1736_s19, %s2010_s19   ;;  %s1671_s18 = sphi %s1734_s18, %s2009_s18  }
   0x7   : > { %s32_s26 = sadd.s32 1, %s1687_s22  ;;  %s125_s27 = sadd.s32 1, %s1679_s20 }
   0x8   : > { %p34_p0 = scmp.ge.s32.totalorder %s32_s26, 2  ;;  %p135_p1 = scmp.ne.s32.totalorder %s1679_s20, %s1675_s19 }
   0x9   : > { %p136_p2 = scmp.eq.s32.totalorder %s1006_s24, 1  ;;  %p141_p3 = scmp.ne.s32.totalorder %s1675_s19, %s1671_s18 }
   0xa   : > { %s2015_s26 = smov (%p34_p0, %s32_s26), 0  ;;  %p142_p5 = scmp.eq.s32.totalorder %s1007_s25, 1 }
   0xb   : > { %1998 = sst [smem:[#allocation18_spill]] %s2015_s26  ;;  %p1774_p4 = por %p136_p2, %p135_p1 }
   0xc   : > { %s120_s29 = ssub.s32 %s1687_s22, %s2015_s26  ;;  %p1008_p6 = scmp.ge.s32.totalorder %s1691_s23, 1 }
   0xd   : > { %s1999_s28 = scalar_select %p1774_p4, 1, 0 }
   0xe   : > { %p123_p7 = scmp.eq.s32.totalorder %s120_s29, 0  ;;  %p1781_p8 = por %p142_p5, %p141_p3 }
   0xf   : > { %p149_p9 = scmp.lt.s32.totalorder %s1691_s23, 3  ;;  %p1793_p11 = scmp.eq.s32.totalorder %s1006_s24, 0 }
  0x10   : > { %s2000_s30 = scalar_select %p1781_p8, 1, 0 }
  0x11   : > { %s1787_s6 = scalar_select %p123_p7, %s1679_s20, %s125_s27  }
  0x12   : > { %p1789_p10 = pnand %p1008_p6, %p149_p9  ;;  %s1693_s9 = smov [#allocation4]  }
  0x13   : > { %s2002_s8 = scalar_select %p1793_p11, 1, 0 }
  0x14   : > { %s2001_s7 = scalar_select %p1789_p10, 1, 0 }
  0x15   : > { %p1449_p12 = pneg %p1789_p10  ;;  %s161_s10 = sshll.u32 %s1693_s9, 4  ;;  %s162_s10 = int_to_ptr.vmem [resolvable:$true] %s161_s10 }
  0x16   : > { %s1694_s12 = smov [#allocation7]   ;;  %s1523_s16 = scalar_lea.hbm %s1988_s1, 3072 }
  0x17   : > { %p1801_p13 = pnand %p1793_p11, %p1449_p12  ;;  %s177_s13 = sshll.u32 %s1694_s12, 4  ;;  %s1805_s13 = int_to_ptr.vmem [resolvable:$true] %s177_s13 }
  0x18   : > { %p1524_p0 = scmp.ne.s32.totalorder %s1988_s1, %s1523_s16  ;;  %p1530_p5 = scmp.lt.u32.totalorder %s1523_s16, %s1988_s1 }
  0x19   : > { %p1525_p1 = pneg %p1801_p13 }
  0x1b   : > { %p1526_p2 = pnand %p1525_p1, %p1524_p0 }
  0x1d   : > { %p1527_p3 = pneg %p1526_p2 }
  0x1f   : > { %p1532_p6 = pnand %p1530_p5, %p1527_p3 }
  0x21   : > { %1535 = shalt.err (!%p1532_p6)
}
  0x22   : > { %s1536_s29 = scalar_lea.vmem %s162_s10, 3072  ;;  %p1544_p8 = scmp.lt.s32.totalorder %s162_s10, %s162_s10 }
  0x23   : > { %p1537_p7 = scmp.ne.s32.totalorder %s162_s10, %s1536_s29  ;;  %p1545_p4 = scmp.lt.s32.totalorder %s1536_s29, %s1536_s29 }
  0x25   : > { %p1539_p9 = pnand %p1537_p7, %p1525_p1  ;;  %p1546_p11 = por %p1545_p4, %p1544_p8 }
  0x27   : > { %p1540_p12 = pneg %p1539_p9 }
  0x29   : > { %p1547_p10 = pnand %p1546_p11, %p1540_p12 }
  0x2b   : > { %1550 = shalt.err (!%p1547_p10)
}
  0x2c   : > { %s1695_s9 = smov 128   ;;  %s1696_s12 = smov 8  }
  0x2d   : > { %1452 = dma.hbm_to_vmem [thread:$0]  (!%p1801_p13), %s1988_s1, 3072, %s162_s10, [#allocation5], %s1695_s9, %s1695_s9, %s1696_s12  }
  0x2e   : > { %s1551_s24 = scalar_lea.hbm %s1990_s3, 6144 }
  0x2f   : > { %p1552_p0 = scmp.ne.s32.totalorder %s1990_s3, %s1551_s24  ;;  %p1558_p10 = scmp.lt.u32.totalorder %s1551_s24, %s1990_s3 }
  0x31   : > { %p1554_p4 = pnand %p1552_p0, %p1525_p1 }
  0x33   : > { %p1555_p8 = pneg %p1554_p4 }
  0x35   : > { %p1560_p11 = pnand %p1558_p10, %p1555_p8 }
  0x37   : > { %1563 = shalt.err (!%p1560_p11)
}
  0x38   : > { %s1564_s10 = scalar_lea.vmem %s1805_s13, 6144  ;;  %p1572_p6 = scmp.lt.s32.totalorder %s1805_s13, %s1805_s13 }
  0x39   : > { %p1565_p2 = scmp.ne.s32.totalorder %s1805_s13, %s1564_s10  ;;  %p1573_p7 = scmp.lt.s32.totalorder %s1564_s10, %s1564_s10 }
  0x3b   : > { %p1567_p3 = pnand %p1565_p2, %p1525_p1  ;;  %p1574_p9 = por %p1573_p7, %p1572_p6 }
  0x3d   : > { %p1568_p5 = pneg %p1567_p3 }
  0x3f   : > { %p1575_p12 = pnand %p1574_p9, %p1568_p5 }
  0x41   : > { %1578 = shalt.err (!%p1575_p12)
}
  0x42   : > { %1455 = dma.hbm_to_vmem [thread:$0]  (!%p1801_p13), %s1990_s3, 6144, %s1805_s13, [#allocation8], %s1695_s9, %s1695_s9, %s1696_s12  }
  0x43   : > { %p2004_p0 = scmp.ne.s32.totalorder %s2001_s7, 0 }
  0x44   : > { %p2005_p4 = scmp.ne.s32.totalorder (!%p2004_p0), %s2002_s8, 0 }
  0x45   : > { %196 = sbr.rel (%p2004_p0) target bundleno = 628 (0x274), region = 36 }
  0x4c   : > { %1656 = dma.done.wait (%p2005_p4), [#allocation5], 3072  }
  0x4d   : > { %1658 = vsyncadd (%p2005_p4), [#allocation5], 4294964224 }
  0x4e   : > { %1660 = dma.done.wait (%p2005_p4), [#allocation8], 6144  }
  0x4f   : > { %1662 = vsyncadd (%p2005_p4), [#allocation8], 4294961152  ;;  %s218_s11 = sand.u32 1, %s1675_s19   ;;  %s1034_s13 = smul.u32 320, %s1683_s21 }
  0x50   : > { %s1014_s7 = sshll.u32 %s218_s11, 4  ;;  %s1697_s16 = smov [#allocation2]  }
  0x51   : > { %s226_s15 = scalar_lea.hbm %s1987_s0, %s1034_s13  ;;  %s234_s17 = sshll.u32 %s1697_s16, 4  ;;  %s235_s17 = int_to_ptr.vmem [resolvable:$true] %s234_s17 }
  0x52   : > { %s1579_s24 = scalar_lea.hbm %s226_s15, 320  ;;  %s1581_s8 = scalar_lea.hbm %s1987_s0, 640 }
  0x53   : > { %p1580_p13 = scmp.ne.s32.totalorder %s226_s15, %s1579_s24  ;;  %p1582_p1 = scmp.lt.u32.totalorder %s226_s15, %s1987_s0 }
  0x54   : > { %p1583_p8 = scmp.lt.u32.totalorder %s1581_s8, %s1579_s24  ;;  %p1585_p11 = scmp.lt.u32.totalorder %s1579_s24, %s226_s15 }
  0x56   : > { %p1584_p10 = por %p1583_p8, %p1582_p1 }
  0x58   : > { %p1586_p2 = por %p1585_p11, %p1584_p10 }
  0x5a   : > { %p1587_p3 = pnand %p1586_p2, %p1580_p13 }
  0x5c   : > { %1590 = shalt.err (!%p1587_p3)  }
  0x5d   : > { %s1591_s26 = scalar_lea.vmem %s235_s17, 320  ;;  %s1595_s14 = scalar_lea.vmem %s235_s17, 384 }
  0x5e   : > { %p1592_p5 = scmp.ne.s32.totalorder %s235_s17, %s1591_s26  ;;  %p1596_p6 = scmp.lt.s32.totalorder %s235_s17, %s235_s17 }
  0x5f   : > { %p1597_p7 = scmp.lt.s32.totalorder %s1595_s14, %s1591_s26 }
  0x61   : > { %p1598_p9 = por %p1597_p7, %p1596_p6 }
  0x63   : > { %p1599_p12 = pnand %p1598_p9, %p1592_p5 }
  0x65   : > { %1602 = shalt.err (!%p1599_p12)  }
  0x66   : > { %237 = dma.hbm_to_vmem [thread:$0]  %s226_s15, 320, %s235_s17, [#allocation3] }
  0x67   : > { %s1877_s13 = scalar_lea.vmem [#allocation9], %s1014_s7 }
  0x68   : > { %1663 = dma.done.wait [#allocation3], 320 }
  0x69   : > { %1664 = vsyncadd [#allocation3], 4294966976  ;;  %v1698_v0 = vmov 0.0|0.0   ;;  %vm1699_vm0 = vmmov 0   ;;  %v1700_v1 = vmov 0.0   ;;  %v256_v2 = vld [vmem:[#allocation4 + $0x40] sm:$0xff] }
  0x6a   : > { %1303 = vmatprep.subr.bf16.mxu0 %v1698_v0  ;;  %1315 = vmatprep.subr.bf16.mxu1 %v1698_v0  ;;  %v257_v3 = vld [vmem:[#allocation4 + $0x48] sm:$0xff]  ;;  %v244_v4 = vld [vmem:[#allocation4] sm:$0xff]  ;;  %v258_v7 = vld [vmem:[#allocation4 + $0x50] sm:$0xff]  ;;  %vm264_vm1 = vcmask 523264   ;;  %vm623_vm3 = vcmask 1046528   ;;  %vm798_vm4 = vcmask 1045504  }
  0x6b   : > { %1139 = vmatprep.mubr.msk.f32.mxu0 %vm1699_vm0, %v1700_v1  ;;  %1164 = vmatprep.mubr.msk.f32.mxu1 %vm1699_vm0, %v1700_v1  ;;  %v1304_v5 = vpack.c.bf16 %v257_v3, %v256_v2  ;;  %v245_v6 = vld [vmem:[#allocation4 + $0x8] sm:$0xff]  ;;  %v259_v8 = vld [vmem:[#allocation4 + $0x58] sm:$0xff]  ;;  %v246_v10 = vld [vmem:[#allocation4 + $0x10] sm:$0xff]  ;;  %s1035_s16 = sshll.u32 %s1683_s21, 8  ;;  %s912_s17 = sshll.u32 %s1877_s13, 4  ;;  %s1935_s17 = int_to_ptr.vmem [resolvable:$true] %s912_s17 }
  0x6c   : > { %v1316_v9 = vpack.c.bf16 %v245_v6, %v244_v4  ;;  %v247_v11 = vld [vmem:[#allocation4 + $0x18] sm:$0xff]  ;;  %v1307_v12 = vpack.c.bf16 %v259_v8, %v258_v7  ;;  %v260_v14 = vld [vmem:[#allocation4 + $0x60] sm:$0xff]  ;;  %v261_v15 = vld [vmem:[#allocation4 + $0x68] sm:$0xff]  ;;  %s1933_s27 = scalar_lea.hbm %s1992_s5, %s1035_s16  ;;  %s1941_s8 = scalar_lea.sflag [#allocation6], %s218_s11 }
  0x6d   : > { %1305 = vmatpush3.bf16.msra.mxu0 %v1304_v5  ;;  %v1319_v13 = vpack.c.bf16 %v247_v11, %v246_v10  ;;  %v248_v16 = vld [vmem:[#allocation4 + $0x20] sm:$0xff]  ;;  %v249_v17 = vld [vmem:[#allocation4 + $0x28] sm:$0xff]  ;;  %v1310_v18 = vpack.c.bf16 %v261_v15, %v260_v14  ;;  %v262_v20 = vld [vmem:[#allocation4 + $0x70] sm:$0xff]  ;;  %s1603_s21 = scalar_lea.vmem %s1935_s17, 256  ;;  %p2006_p4 = scmp.ne.s32.totalorder %s1999_s28, 0 }
  0x6e   : > { %1317 = vmatpush3.bf16.msra.mxu1 %v1316_v9  ;;  %1306 = vmatprep.subr.bf16.mxu0 %v1698_v0  ;;  %v1322_v19 = vpack.c.bf16 %v249_v17, %v248_v16  ;;  %v263_v21 = vld [vmem:[#allocation4 + $0x78] sm:$0xff]  ;;  %v250_v22 = vld [vmem:[#allocation4 + $0x30] sm:$0xff]  ;;  %v587_v25 = vld [vmem:[#allocation7] sm:$0xff]  ;;  %p1604_p0 = scmp.ne.s32.totalorder %s1935_s17, %s1603_s21  ;;  %s1701_s29 = smov [#allocation9]  }
  0x6f   : > { %1318 = vmatprep.subr.bf16.mxu1 %v1698_v0  ;;  %v251_v23 = vld [vmem:[#allocation4 + $0x38] sm:$0xff]  ;;  %v1313_v24 = vpack.c.bf16 %v263_v21, %v262_v20  ;;  %v588_v26 = vld [vmem:[#allocation7 + $0x8] sm:$0xff]  ;;  %v447_v28 = vld [vmem:[#allocation4 + $0x80] sm:$0xff]  ;;  %s1607_s10 = sshll.u32 %s1701_s29, 4  ;;  %s1608_s10 = int_to_ptr.vmem [resolvable:$false] %s1607_s10 }
  0x70   : > { %v1325_v27 = vpack.c.bf16 %v251_v23, %v250_v22  ;;  %v448_v29 = vld [vmem:[#allocation4 + $0x88] sm:$0xff]  ;;  %v1371_v30 = vpack.c.bf16 %v588_v26, %v587_v25  ;;  %v589_v33 = vld [vmem:[#allocation7 + $0x10] sm:$0xff]  ;;  %v590_v34 = vld [vmem:[#allocation7 + $0x18] sm:$0xff]  ;;  %p1605_p13 = pnand %p1604_p0, %p2006_p4  ;;  %s1609_s26 = scalar_lea.vmem %s1608_s10, 512 }
  0x71   : > { %1308 = vmatpush3.bf16.msra.mxu0 %v1307_v12  ;;  %v252_v31 = vld [vmem:[#allocation2 + $0x1] sm:$0xff]  ;;  %v1328_v32 = vpack.c.bf16 %v448_v29, %v447_v28  ;;  %v450_v37 = vld [vmem:[#allocation4 + $0x98] sm:$0xff]  ;;  %v1375_v38 = vpack.c.bf16 %v590_v34, %v589_v33  ;;  %v451_v42 = vld [vmem:[#allocation4 + $0xa0] sm:$0xff]  ;;  %p1610_p8 = scmp.lt.s32.totalorder %s1935_s17, %s1608_s10  ;;  %p1611_p10 = scmp.lt.s32.totalorder %s1609_s26, %s1603_s21 }
  0x72   : > { %1320 = vmatpush3.bf16.msra.mxu1 %v1319_v13  ;;  %1309 = vmatprep.subr.bf16.mxu0 %v1698_v0  ;;  %v241_v35 = vld [vmem:[#allocation2] sm:$0xff]  ;;  %v449_v36 = vld [vmem:[#allocation4 + $0x90] sm:$0xff]  ;;  %v254_v45 = vld [vmem:[#allocation2 + $0x11] sm:$0x3]  ;;  %p1606_p1 = pneg %p1605_p13 }
  0x73   : > { %1321 = vmatprep.subr.bf16.mxu1 %v1698_v0  ;;  %v1331_v39 = vpack.c.bf16 %v450_v37, %v449_v36  ;;  %v253_v40 = vld [vmem:[#allocation2 + $0x9] sm:$0xff]  ;;  %v452_v43 = vld [vmem:[#allocation4 + $0xa8] sm:$0xff]  ;;  %v445_v52 = vld [vmem:[#allocation2 + $0x12] sm:$0x3]  ;;  %p1612_p11 = por %p1611_p10, %p1610_p8 }
  0x74   : > { %v242_v41 = vld [vmem:[#allocation2 + $0x8] sm:$0xff]  ;;  %v1334_v44 = vpack.c.bf16 %v452_v43, %v451_v42  ;;  %v243_v46 = vld [vmem:[#allocation2 + $0x10] sm:$0x3]  ;;  %v591_v53 = vld [vmem:[#allocation7 + $0x20] sm:$0xff] }
  0x75   : > { %1311 = vmatpush3.bf16.msra.mxu0 %v1310_v18  ;;  %v453_v47 = vld [vmem:[#allocation4 + $0xb0] sm:$0xff]  ;;  %v454_v48 = vld [vmem:[#allocation4 + $0xb8] sm:$0xff]  ;;  %v592_v54 = vld [vmem:[#allocation7 + $0x28] sm:$0xff]  ;;  %p1613_p2 = pnand %p1612_p11, %p1606_p1 }
  0x76   : > { %1323 = vmatpush3.bf16.msra.mxu1 %v1322_v19  ;;  %1312 = vmatprep.subr.bf16.mxu0 %v1698_v0  ;;  %v1337_v49 = vpack.c.bf16 %v454_v48, %v453_v47  ;;  %v443_v50 = vld [vmem:[#allocation2 + $0x2] sm:$0xff]  ;;  %v444_v51 = vld [vmem:[#allocation2 + $0xa] sm:$0xff]  ;;  %v1379_v55 = vpack.c.bf16 %v592_v54, %v591_v53  ;;  %v604_v56 = vld [vmem:[#allocation7 + $0x80] sm:$0xff] }
  0x77   : > { %1324 = vmatprep.subr.bf16.mxu1 %v1698_v0  ;;  %v605_v57 = vld [vmem:[#allocation7 + $0x88] sm:$0xff]  ;;  %v593_v59 = vld [vmem:[#allocation7 + $0x30] sm:$0xff]  ;;  %v594_v60 = vld [vmem:[#allocation7 + $0x38] sm:$0xff] }
  0x78   : > { %v1339_v58 = vpack.c.bf16 %v605_v57, %v604_v56  ;;  %v1383_v61 = vpack.c.bf16 %v594_v60, %v593_v59  ;;  %v606_v62 = vld [vmem:[#allocation7 + $0x90] sm:$0xff]  ;;  %v607_v63 = vld [vmem:[#allocation7 + $0x98] sm:$0xff]  ;;  %v596_v2 = vld [vmem:[#allocation7 + $0x48] sm:$0xff] }
  0x79   : > { %1314 = vmatpush3.bf16.msra.mxu0 %v1313_v24  ;;  %v608_v4 = vld [vmem:[#allocation7 + $0xa0] sm:$0xff]  ;;  %v609_v5 = vld [vmem:[#allocation7 + $0xa8] sm:$0xff]  ;;  %v597_v7 = vld [vmem:[#allocation7 + $0x50] sm:$0xff] }
  0x7a   : > { %1326 = vmatpush3.bf16.msra.mxu1 %v1325_v27  ;;  %1327 = vmatprep.subr.bf16.mxu0 %v1698_v0  ;;  %v1347_v6 = vpack.c.bf16 %v609_v5, %v608_v4  ;;  %v598_v8 = vld [vmem:[#allocation7 + $0x58] sm:$0xff]  ;;  %v610_v9 = vld [vmem:[#allocation7 + $0xb0] sm:$0xff]  ;;  %v599_v13 = vld [vmem:[#allocation7 + $0x60] sm:$0xff] }
  0x7b   : > { %1372 = vmatprep.subr.bf16.mxu1 %v1371_v30  ;;  %v1391_v10 = vpack.c.bf16 %v598_v8, %v597_v7  ;;  %v611_v11 = vld [vmem:[#allocation7 + $0xb8] sm:$0xff]  ;;  %v600_v14 = vld [vmem:[#allocation7 + $0x68] sm:$0xff]  ;;  %v612_v16 = vld [vmem:[#allocation7 + $0xc0] sm:$0xff] }
  0x7c   : > { %1140 = vmatmul.mubr.msk.f32.vlgmr.msra.gmra.mrb[0].mxu0 %vm264_vm1, %v252_v31  ;;  %v1351_v12 = vpack.c.bf16 %v611_v11, %v610_v9  ;;  %v1395_v15 = vpack.c.bf16 %v600_v14, %v599_v13  ;;  %v613_v17 = vld [vmem:[#allocation7 + $0xc8] sm:$0xff]  ;;  %v601_v19 = vld [vmem:[#allocation7 + $0x70] sm:$0xff]  ;;  %v602_v20 = vld [vmem:[#allocation7 + $0x78] sm:$0xff] }
  0x7d   : > { %1165 = vmatmul.mubr.msk.f32.vlgmr.msra.gmra.mrb[0].mxu1 %vm264_vm1, %v241_v35  ;;  %1329 = vmatpush3.bf16.msra.mxu0 %v1328_v32  ;;  %v1355_v18 = vpack.c.bf16 %v613_v17, %v612_v16  ;;  %v1399_v21 = vpack.c.bf16 %v602_v20, %v601_v19  ;;  %v614_v22 = vld [vmem:[#allocation7 + $0xd0] sm:$0xff]  ;;  %v615_v23 = vld [vmem:[#allocation7 + $0xd8] sm:$0xff]  ;;  %v782_v25 = vld [vmem:[#allocation7 + $0x100] sm:$0xff] }
  0x7e   : > { %1330 = vmatprep.subr.bf16.mxu0 %v1698_v0  ;;  %1142 = vmatprep.mubr.msk.f32.mxu0 %vm1699_vm0, %v1700_v1  ;;  %v1359_v24 = vpack.c.bf16 %v615_v23, %v614_v22  ;;  %v783_v26 = vld [vmem:[#allocation7 + $0x108] sm:$0xff]  ;;  %v616_v28 = vld [vmem:[#allocation7 + $0xe0] sm:$0xff]  ;;  %v618_v31 = vld [vmem:[#allocation7 + $0xf0] sm:$0xff] }
  0x7f   : > { %1167 = vmatprep.mubr.msk.f32.mxu1 %vm1699_vm0, %v1700_v1  ;;  %1374 = vmatpush3.bf16.msra.mxu1 %v1371_v30  ;;  %v1403_v27 = vpack.c.bf16 %v783_v26, %v782_v25  ;;  %v617_v29 = vld [vmem:[#allocation7 + $0xe8] sm:$0xff]  ;;  %v619_v32 = vld [vmem:[#allocation7 + $0xf8] sm:$0xff]  ;;  %v786_v9 = vld [vmem:[#allocation7 + $0x120] sm:$0xff] }
  0x80   : > { %1143 = vmatmul.mubr.msk.f32.gmra.mrb[2].mxu0 %vm264_vm1, %v253_v40  ;;  %1376 = vmatprep.subr.bf16.mxu1 %v1375_v38  ;;  %v1363_v30 = vpack.c.bf16 %v617_v29, %v616_v28  ;;  %v1367_v33 = vpack.c.bf16 %v619_v32, %v618_v31  ;;  %v788_v19 = vld [vmem:[#allocation7 + $0x130] sm:$0xff]  ;;  %v789_v20 = vld [vmem:[#allocation7 + $0x138] sm:$0xff]  ;;  %v790_v26 = vld [vmem:[#allocation7 + $0x140] sm:$0xff] }
  0x81   : > { %1332 = vmatpush3.bf16.msra.mxu0 %v1331_v39  ;;  %1168 = vmatmul.mubr.msk.f32.gmra.mrb[2].mxu1 %vm264_vm1, %v242_v41  ;;  %v793_v31 = vld [vmem:[#allocation7 + $0x158] sm:$0xff] }
  0x82   : > { %1333 = vmatprep.subr.bf16.mxu0 %v1698_v0  ;;  %1145 = vmatprep.mubr.msk.f32.mxu0 %vm1699_vm0, %v1700_v1 }
  0x83   : > { %1170 = vmatprep.mubr.msk.f32.mxu1 %vm1699_vm0, %v1700_v1  ;;  %1378 = vmatpush3.bf16.msra.mxu1 %v1375_v38 }
  0x84   : > { %1146 = vmatmul.mubr.msk.f32.gmra.mrb[4].mxu0 %vm264_vm1, %v254_v45  ;;  %1380 = vmatprep.subr.bf16.mxu1 %v1379_v55  ;;  %v561_v45 = vlaneseq }
  0x85   : > { %1335 = vmatpush3.bf16.msra.mxu0 %v1334_v44  ;;  %1171 = vmatmul.mubr.msk.f32.gmra.mrb[4].mxu1 %vm264_vm1, %v243_v46 }
  0x86   : > { %1336 = vmatprep.subr.bf16.mxu0 %v1698_v0  ;;  %1189 = vmatprep.mubr.msk.f32.mxu0 %vm1699_vm0, %v1700_v1  ;;  %v1343_v0 = vpack.c.bf16 %v607_v63, %v606_v62  ;;  %v784_v62 = vld [vmem:[#allocation7 + $0x110] sm:$0xff]  ;;  %v785_v63 = vld [vmem:[#allocation7 + $0x118] sm:$0xff] }
  0x87   : > { %1382 = vmatpush3.bf16.msra.mxu1 %v1379_v55 }
  0x88   : > { %1384 = vmatprep.subr.bf16.mxu1 %v1383_v61 }
  0x89   : > { %1338 = vmatpush3.bf16.msra.mxu0 %v1337_v49 }
  0x8a   : > { %1340 = vmatprep.subr.bf16.mxu0 %v1339_v58 }
  0x8b   : > { %1386 = vmatpush3.bf16.msra.mxu1 %v1383_v61 }
  0x8c   : > { %1190 = vmatmul.mubr.msk.f32.vlgmr.msra.gmra.mrb[6].mxu0 %vm264_vm1, %v443_v50  ;;  %v562_v50 = vshrl.u32 %v561_v45, 7 }
  0x8d   : > { %1192 = vmatprep.mubr.msk.f32.mxu0 %vm1699_vm0, %v1700_v1  ;;  %1342 = vmatpush3.bf16.msra.mxu0 %v1339_v58 }
  0x8e   : > { %1344 = vmatprep.subr.bf16.mxu0 %v1343_v0  ;;  %v566_v53 = vadd.s32 4294967295, %v562_v50  ;;  %v564_v58 = vadd.s32 16, %v562_v50 }
  0x90   : > { %1193 = vmatmul.mubr.msk.f32.gmra.mrb[8].mxu0 %vm264_vm1, %v444_v51  ;;  %vm569_vm2 = vcmp.ge.s32.totalorder %v566_v53, 0 }
  0x91   : > { %1195 = vmatprep.mubr.msk.f32.mxu0 %vm1699_vm0, %v1700_v1  ;;  %v595_v1 = vld [vmem:[#allocation7 + $0x40] sm:$0xff]  ;;  %1346 = vmatpush3.bf16.msra.mxu0 %v1343_v0 }
  0x92   : > { %v1387_v3 = vpack.c.bf16 %v596_v2, %v595_v1  ;;  %1348 = vmatprep.subr.bf16.mxu0 %v1347_v6 }
  0x94   : > { %1196 = vmatmul.mubr.msk.f32.gmra.mrb[10].mxu0 %vm264_vm1, %v445_v52  ;;  %1388 = vmatprep.subr.bf16.mxu1 %v1387_v3  ;;  %v1025_v52 = vld [vmem:[%s1989_s2] ss:$0 sm:$0xff] }
  0x95   : > { %1390 = vmatpush3.bf16.msra.mxu1 %v1387_v3  ;;  %1350 = vmatpush3.bf16.msra.mxu0 %v1347_v6  ;;  %v568_v3 = vadd.s32 4294967295, %v564_v58  ;;  %v1407_v6 = vpack.c.bf16 %v785_v63, %v784_v62 }
  0x96   : > { %1392 = vmatprep.subr.bf16.mxu1 %v1391_v10  ;;  %1352 = vmatprep.subr.bf16.mxu0 %v1351_v12 }
  0x97   : > { %vm574_vm5 = vcmp.lt.s32.totalorder %v568_v3, 16 }
  0x99   : > { %1394 = vmatpush3.bf16.msra.mxu1 %v1391_v10  ;;  %1354 = vmatpush3.bf16.msra.mxu0 %v1351_v12  ;;  %v787_v10 = vld [vmem:[#allocation7 + $0x128] sm:$0xff] }
  0x9a   : > { %1396 = vmatprep.subr.bf16.mxu1 %v1395_v15  ;;  %1356 = vmatprep.subr.bf16.mxu0 %v1355_v18 }
  0x9d   : > { %1398 = vmatpush3.bf16.msra.mxu1 %v1395_v15  ;;  %1358 = vmatpush3.bf16.msra.mxu0 %v1355_v18  ;;  %v1411_v18 = vpack.c.bf16 %v787_v10, %v786_v9 }
  0x9e   : > { %1400 = vmatprep.subr.bf16.mxu1 %v1399_v21  ;;  %1360 = vmatprep.subr.bf16.mxu0 %v1359_v24 }
  0xa1   : > { %1402 = vmatpush3.bf16.msra.mxu1 %v1399_v21  ;;  %1362 = vmatpush3.bf16.msra.mxu0 %v1359_v24  ;;  %v1415_v24 = vpack.c.bf16 %v789_v20, %v788_v19 }
  0xa2   : > { %1404 = vmatprep.subr.bf16.mxu1 %v1403_v27  ;;  %1364 = vmatprep.subr.bf16.mxu0 %v1363_v30 }
  0xa5   : > { %1366 = vmatpush3.bf16.msra.mxu0 %v1363_v30  ;;  %v792_v30 = vld [vmem:[#allocation7 + $0x150] sm:$0xff] }
  0xa6   : > { %1368 = vmatprep.subr.bf16.mxu0 %v1367_v33  ;;  %v1423_v32 = vpack.c.bf16 %v793_v31, %v792_v30 }
  0xa9   : > { %1370 = vmatpush3.bf16.msra.mxu0 %v1367_v33  ;;  %v794_v33 = vld [vmem:[#allocation7 + $0x160] sm:$0xff] }
 0x14f   : > { %v340_v34 = vpop.f32.mrb[0].mxu0 }
 0x150   : > { %v1141_v35 = vpop.f32.mrb[1].mxu0  ;;  %v429_v36 = vpop.f32.mrb[0].mxu1 }
 0x151   : > { %v430_v37 = vadd.f32 %v429_v36, %v340_v34  ;;  %v1166_v38 = vpop.f32.mrb[1].mxu1  ;;  %v795_v34 = vld [vmem:[#allocation7 + $0x168] sm:$0xff]  ;;  %v796_v36 = vld [vmem:[#allocation7 + $0x170] sm:$0xff] }
 0x152   : > { %v1427_v35 = vpack.c.bf16 %v795_v34, %v794_v33 }
 0x153   : > { %v345_v39 = vpop.f32.mrb[2].mxu0 }
 0x154   : > { %v1144_v40 = vpop.f32.mrb[3].mxu0  ;;  %v434_v41 = vpop.f32.mrb[2].mxu1 }
 0x155   : > { %v435_v42 = vadd.f32 %v434_v41, %v345_v39  ;;  %v1169_v43 = vpop.f32.mrb[3].mxu1 }
 0x157   : > { %v350_v44 = vpop.f32.mrb[4].mxu0 }
 0x158   : > { %v1147_v46 = vpop.f32.mrb[5].mxu0  ;;  %v439_v47 = vpop.f32.mrb[4].mxu1 }
 0x159   : > { %v440_v48 = vadd.f32 %v439_v47, %v350_v44  ;;  %v1172_v49 = vpop.f32.mrb[5].mxu1 }
 0x15f   : > { %v530_v51 = vpop.f32.mrb[6].mxu0 }
 0x160   : > { %v544_v54 = vadd.f32 %v530_v51, %v430_v37  ;;  %v1191_v55 = vpop.f32.mrb[7].mxu0  ;;  %v797_v37 = vld [vmem:[#allocation7 + $0x178] sm:$0xff] }
 0x161   : > { %v1431_v38 = vpack.c.bf16 %v797_v37, %v796_v36 }
 0x162   : > { %v554_v56 = vadd.f32 %v1025_v52, %v544_v54 }
 0x163   : > { %v535_v57 = vpop.f32.mrb[8].mxu0 }
 0x164   : > { %v557_v59 = vmax.f32 %v554_v56, 0.0  ;;  %v545_v60 = vadd.f32 %v535_v57, %v435_v42  ;;  %v1194_v61 = vpop.f32.mrb[9].mxu0  ;;  %v1027_v42 = vld [vmem:[%s1991_s4] ss:$0 sm:$0xff] }
 0x166   : > { %v555_v0 = vadd.f32 %v1025_v52, %v545_v60  ;;  %v584_v1 = vsel %vm569_vm2, %v557_v59, 0.0  ;;  %1265 = vmatprep.mubr.msk.f32.mxu1 %vm569_vm2, %v557_v59 }
 0x167   : > { %v540_v2 = vpop.f32.mrb[10].mxu0  ;;  %v624_v8 = vrot.slane %v584_v1, 1  ;;  %v799_v11 = vrot.slane %v584_v1, 2 }
 0x168   : > { %v558_v4 = vmax.f32 %v555_v0, 0.0  ;;  %v546_v5 = vadd.f32 %v540_v2, %v440_v48  ;;  %v1197_v7 = vpop.f32.mrb[11].mxu0 }
 0x16a   : > { %v556_v12 = vadd.f32 %v1025_v52, %v546_v5  ;;  %1266 = vmatmul.mubr.f32.vlgmr.msra.gmra.mrb[6].mxu1 %v558_v4  ;;  %v625_v13 = vrot.slane %v558_v4, 1  ;;  %v800_v14 = vrot.slane %v558_v4, 2 }
 0x16b   : > { %1406 = vmatpush3.bf16.msra.mxu1 %v1403_v27  ;;  %v791_v27 = vld [vmem:[#allocation7 + $0x148] sm:$0xff] }
 0x16c   : > { %v559_v15 = vmax.f32 %v556_v12, 0.0  ;;  %v626_v16 = vsel %vm623_vm3, %v624_v8, %v625_v13  ;;  %1408 = vmatprep.subr.bf16.mxu1 %v1407_v6  ;;  %v801_v17 = vsel %vm798_vm4, %v799_v11, %v800_v14  ;;  %v1419_v29 = vpack.c.bf16 %v791_v27, %v790_v26 }
 0x16d   : > { %1230 = vmatprep.mubr.f32.mxu0 %v626_v16  ;;  %1300 = vmatprep.mubr.f32.mxu1 %v801_v17 }
 0x16e   : > { %v586_v21 = vsel %vm574_vm5, %v559_v15, 0.0 }
 0x16f   : > { %v627_v22 = vrot.slane %v586_v21, 1  ;;  %v802_v23 = vrot.slane %v586_v21, 2  ;;  %1410 = vmatpush3.bf16.msra.mxu1 %v1407_v6 }
 0x170   : > { %1412 = vmatprep.subr.bf16.mxu1 %v1411_v18 }
 0x171   : > { %v628_v25 = vsel %vm623_vm3, %v625_v13, %v627_v22  ;;  %v803_v28 = vsel %vm798_vm4, %v800_v14, %v802_v23 }
 0x172   : > { %1231 = vmatmul.mubr.f32.vlgmr.msra.gmra.mrb[12].mxu0 %v628_v25 }
 0x173   : > { %1414 = vmatpush3.bf16.msra.mxu1 %v1411_v18 }
 0x174   : > { %1416 = vmatprep.subr.bf16.mxu1 %v1415_v24 }
 0x177   : > { %1418 = vmatpush3.bf16.msra.mxu1 %v1415_v24 }
 0x178   : > { %1420 = vmatprep.subr.bf16.mxu1 %v1419_v29 }
 0x17b   : > { %1422 = vmatpush3.bf16.msra.mxu1 %v1419_v29 }
 0x17c   : > { %1424 = vmatprep.subr.bf16.mxu1 %v1423_v32 }
 0x17f   : > { %1426 = vmatpush3.bf16.msra.mxu1 %v1423_v32 }
 0x180   : > { %1428 = vmatprep.subr.bf16.mxu1 %v1427_v35 }
 0x183   : > { %1430 = vmatpush3.bf16.msra.mxu1 %v1427_v35 }
 0x184   : > { %1432 = vmatprep.subr.bf16.mxu1 %v1431_v38 }
 0x187   : > { %1434 = vmatpush3.bf16.msra.mxu1 %v1431_v38 }
 0x18a   : > { %1301 = vmatmul.mubr.f32.vlgmr.msra.gmra.mrb[6].mxu1 %v803_v28 }
 0x245   : > { %v1232_v39 = vpop.f32.mrb[12].mxu0 }
 0x246   : > { %v697_v40 = vpop.f32.mrb[13].mxu0 }
 0x25d   : > { %v1302_v41 = vpop.f32.mrb[6].mxu1 }
 0x25e   : > { %v1435_v43 = vadd.f32 %v1302_v41, %v1232_v39  ;;  %v872_v44 = vpop.f32.mrb[7].mxu1 }
 0x25f   : > { %v1436_v45 = vadd.f32 %v872_v44, %v697_v40 }
 0x260   : > { %v891_v46 = vadd.f32 %v1435_v43, %v1027_v42 }
 0x261   : > { %v890_v47 = vadd.f32 %v1436_v45, %v1027_v42 }
 0x262   : > { %v893_v48 = vmax.f32 %v891_v46, 0.0 }
 0x263   : > { %v892_v49 = vmax.f32 %v890_v47, 0.0 }
 0x264   : > { %895 = vst [vmem:[%s1877_s13 + $0x8] sm:$0xff] %v893_v48 }
 0x265   : > { %894 = vst [vmem:[%s1877_s13] sm:$0xff] %v892_v49 }
 0x266   : > { %1616 = shalt.err (!%p1613_p2)
}
 0x267   : > { %s1617_s11 = scalar_lea.hbm %s1933_s27, 256  ;;  %s1621_s7 = scalar_lea.hbm %s1992_s5, 512 }
 0x268   : > { %p1618_p3 = scmp.ne.s32.totalorder %s1933_s27, %s1617_s11  ;;  %p1622_p7 = scmp.lt.u32.totalorder %s1933_s27, %s1992_s5 }
 0x269   : > { %p1623_p9 = scmp.lt.u32.totalorder %s1621_s7, %s1617_s11  ;;  %p1625_p0 = scmp.lt.u32.totalorder %s1617_s11, %s1933_s27 }
 0x26a   : > { %p1619_p5 = pnand %p1618_p3, %p2006_p4 }
 0x26b   : > { %p1624_p12 = por %p1623_p9, %p1622_p7 }
 0x26c   : > { %p1620_p6 = pneg %p1619_p5 }
 0x26d   : > { %p1626_p13 = por %p1625_p0, %p1624_p12 }
 0x26f   : > { %p1627_p1 = pnand %p1626_p13, %p1620_p6 }
 0x271   : > { %1630 = shalt.err (!%p1627_p1)
}
 0x272   : > { %s1702_s15 = smov 128   ;;  %s1703_s16 = smov 8  }
 0x273   : > { %1447 = dma.vmem_to_hbm [thread:$0]  (%p2006_p4), %s1935_s17, 256, %s1933_s27, %s1941_s8, %s1702_s15, %s1702_s15, %s1703_s16  }
 0x274 PF: > { %p1464_p8 = scmp.ge.s32.totalorder %s1691_s23, 2  ;;  %s927_s24 = sand.u32 1, %s1671_s18  }
 0x275   : > { %p2007_p10 = scmp.ne.s32.totalorder %s2000_s30, 0  ;;  %s928_s25 = scalar_lea.sflag [#allocation6], %s927_s24 }
 0x277   : > { %p1457_p11 = pnand %p1464_p8, %p2007_p10 }
 0x279   : > { %1666 = dma.done.wait (!%p1457_p11), %s928_s25, 256  }
 0x27a   : > { %1668 = vsyncadd (!%p1457_p11), %s928_s25, 4294967040  ;;  %s20_s23 = sadd.s32 1, %s1691_s23   ;;  %s2008_s28 = sld [smem:[#allocation18_spill]] }
 0x27b   : > { %p17_p2 = scmp.ge.s32.totalorder %s20_s23, 4   ;;  %s2009_s18 = smov %s1675_s19 }
 0x27c   : > { %s2010_s19 = smov %s1679_s20  ;;  %s2011_s20 = smov %s1787_s6 }
 0x27d   : > { %s2012_s21 = smov %s1687_s22  ;;  %19 = sbr.rel (!%p17_p2) target bundleno = 6 (0x6), region = 86 }
 0x280   : > { %s2013_s22 = smov %s2008_s28 }
 0x284   :  { %933 = vsyncpa [#allocation5], 1 }
 0x285   :  { %935 = vsyncpa [#allocation5 + $0x1], 1 }
 0x286   :  { %936 = vsyncpa [#allocation8], 1 }
 0x287   :  { %937 = vsyncpa [#allocation6], 1 }
 0x288   :  { %939 = vsyncpa [#allocation6 + $0x1], 1 }
 0x289   :  { %940 = vsyncmov [#allocation3] }
 0x28c   :  { %s941_s30 = vpop.sfrf %940 }
 0x28d   :  { %p1033_p4 = scmp.ne.s32.totalorder %s941_s30, 0 }
 0x28f   :  { %945 = shalt.err (%p1033_p4)  }

</bundles_post_ra>
